<compile_context>
chip_gen: v5e
topology: v5e:2x2
jax: 0.10.0
libtpu: 0.0.40
codegen_flags: <defaults>
</compile_context>

<pallas_src>
import functools

import jax
import jax.numpy as jnp
from jax.experimental import pallas as pl
from jax.experimental.pallas import tpu as pltpu


def _round_up(x, m):
    return ((x + m - 1) // m) * m


def _cdiv(a, b):
    return -(-a // b)


_SUBLANE = 16       # bf16 sublane packing: native (16, 128) tile
_MIN_SPLIT_B = 512  # batches at least this big get >= 2 tiles (v7x megacore)


# ----------------------------------------------------------------------------
# Pallas kernel: fused propNN MLP over one batch tile.
# ----------------------------------------------------------------------------
def _mlp_kernel(n_hidden, h_ref, *refs):
    """refs = (w_0, ..., w_{n_hidden-1}, params_ref, out_ref).

    h_ref      : (TB, latent)        bf16 batch tile (fed to the MXU directly)
    w_i        : (in_i, Hp)          bf16 zero-padded hidden weights
    params_ref : (n_hidden + 2, Hp)  f32; row i < n_hidden -> bias_i (0-padded)
                                     row n_hidden     -> final weight column
                                     row n_hidden + 1 -> [b_last, 0, ...]
    out_ref    : (1, 1, TB)          f32 lane-dense output slab
    """
    w_refs = refs[:n_hidden]
    params_ref = refs[n_hidden]
    out_ref = refs[n_hidden + 1]

    act = h_ref[...]                                            # bf16
    for i in range(n_hidden):
        w = w_refs[i][...]                                      # bf16 (in_i, Hp)
        b = params_ref[pl.ds(i, 1), :]                          # f32  (1, Hp)
        pre = jnp.dot(act, w, preferred_element_type=jnp.float32) + b
        act_f32 = jnp.tanh(pre)                                 # f32 (TB, Hp)
        # next matmul LHS goes back to bf16 (MXU-native); last hidden layer
        # stays f32 for the VPU reduce below.
        act = act_f32.astype(jnp.bfloat16) if i + 1 < n_hidden else act_f32

    # Final [Hp -> 1] layer as a VPU multiply + lane (XLU) reduction instead
    # of a degenerate N=1 MXU matmul; padded lanes of act / w_last are 0.
    w_last = params_ref[pl.ds(n_hidden, 1), :]                  # f32 (1, Hp)
    b_last = params_ref[n_hidden + 1, 0]                        # f32 scalar
    y = jnp.sum(act * w_last, axis=-1) + b_last                 # (TB,)
    out_ref[...] = y[None, None, :].astype(out_ref.dtype)


# ----------------------------------------------------------------------------
# Parameter packing (done once, at model construction)
# ----------------------------------------------------------------------------
def pack_prop_params(weights, biases):
    """Pad hidden weights to 128 lanes (bf16) and pack all small params
    (biases + final layer) into one f32 operand."""
    n_hidden = len(weights) - 1
    latent = int(weights[0].shape[0])
    hidden_dims = [int(w.shape[1]) for w in weights[:-1]]
    hp = _round_up(max(hidden_dims), 128)   # keep at 128: MXU time not binding

    w_pads = []
    in_dim = latent
    for i in range(n_hidden):
        w = weights[i].astype(jnp.float32)
        w_p = (jnp.zeros((in_dim, hp), jnp.float32)
               .at[: w.shape[0], : w.shape[1]].set(w))
        w_pads.append(w_p.astype(jnp.bfloat16))
        in_dim = hp

    params = jnp.zeros((n_hidden + 2, hp), jnp.float32)
    for i in range(n_hidden):
        bi = biases[i].reshape(-1).astype(jnp.float32)
        params = params.at[i, : bi.shape[0]].set(bi)
    w_last = weights[-1].reshape(-1).astype(jnp.float32)
    params = params.at[n_hidden, : w_last.shape[0]].set(w_last)
    params = params.at[n_hidden + 1, 0].set(
        biases[-1].reshape(-1)[0].astype(jnp.float32))
    return w_pads, params, hp


# ----------------------------------------------------------------------------
# Tiling / VMEM helpers
# ----------------------------------------------------------------------------
def _batch_tiling(B, block_b):
    """Choose (tile_rows, num_tiles) for the batch grid.

    - tile_rows is a multiple of 16 (bf16 sublanes) unless one full-dim tile
      covers the whole batch (always legal).
    - batches >= _MIN_SPLIT_B aim for an even tile count >= 2 so the two v7x
      TensorCores both get work (no-op on single-TC v5e/v6e); best effort.
    """
    block_b = max(_SUBLANE, (block_b // _SUBLANE) * _SUBLANE)
    nt = _cdiv(B, block_b)
    if B >= _MIN_SPLIT_B:
        nt = max(nt, 2)
    if nt <= 1:
        return B, 1                     # single full-dim tile
    if nt % 2:
        nt += 1                         # even split across the two v7x cores
    tb = _round_up(_cdiv(B, nt), _SUBLANE)
    nt = _cdiv(B, tb)                   # may drop after rounding (best effort)
    return tb, nt


def _vmem_per_step_bytes(tb, latent, hp, w_elems, p_elems):
    h_bytes = 2 * tb * latent * 2       # double-buffered bf16 batch tile
    out_bytes = 2 * tb * 4              # double-buffered f32 output slab
    w_bytes = w_elems * 2               # single-buffered bf16 weights
    p_bytes = p_elems * 4               # single-buffered f32 packed params
    act_bytes = 4 * tb * hp * 4         # act / tanh / bf16 copy / dot scratch
    act_bytes += tb * latent * 2        # bf16 LHS staging of the first matmul
    return h_bytes + out_bytes + w_bytes + p_bytes + act_bytes


# ----------------------------------------------------------------------------
# Wrapper: tiling, pallas_call
# ----------------------------------------------------------------------------
def prop_nn_pallas(h, w_pads, params, *, block_b=2048):
    """Fused propNN MLP  [B, latent] -> [B, 1]  in a single Pallas kernel."""
    n_hidden = len(w_pads)
    assert n_hidden >= 1, "propNN expects at least one hidden layer"
    B, latent = h.shape
    hp = int(w_pads[0].shape[1])
    assert int(w_pads[0].shape[0]) == latent

    # bf16 operands: MXU takes bf16 directly (f32 accumulation). Ideally h is
    # already bf16 from to_latent_format so this cast fuses upstream instead
    # of adding an HBM round trip.
    if h.dtype != jnp.bfloat16:
        h = h.astype(jnp.bfloat16)

    tb, num_tiles = _batch_tiling(B, block_b)

    w_elems = sum(int(w.size) for w in w_pads)
    p_elems = int(params.size)

    # Shrink the batch tile if the per-step VMEM footprint (pipelined buffers
    # + compiler-managed activation intermediates) would crowd the 32 MiB
    # scoped cap (the limit that matters on v7x's 64 MiB physical VMEM).
    per_step = _vmem_per_step_bytes(tb, latent, hp, w_elems, p_elems)
    while per_step > 24 * 2**20 and tb > _SUBLANE:
        tb = max(_SUBLANE, (tb // 2 // _SUBLANE) * _SUBLANE)
        num_tiles = _cdiv(B, tb)
        per_step = _vmem_per_step_bytes(tb, latent, hp, w_elems, p_elems)
    vmem_limit = int(min(max(8 * 2**20, int(1.5 * per_step)), 32 * 2**20))

    rows = num_tiles * tb
    cost = pl.CostEstimate(
        flops=2 * rows * (latent * hp + max(n_hidden - 1, 0) * hp * hp + hp),
        transcendentals=rows * hp * n_hidden,
        bytes_accessed=(2 * int(h.size) + 2 * w_elems + 4 * p_elems + 4 * rows),
    )

    in_specs = [pl.BlockSpec((tb, latent), lambda i: (i, 0))]
    # Weights / packed params: constant index_map keeps them VMEM-resident
    # across the grid; single-buffered (they never change) to halve footprint.
    in_specs += [pl.BlockSpec(w.shape, lambda i: (0, 0),
                              pipeline_mode=pl.Buffered(1)) for w in w_pads]
    in_specs += [pl.BlockSpec(params.shape, lambda i: (0, 0),
                              pipeline_mode=pl.Buffered(1))]

    out = pl.pallas_call(
        functools.partial(_mlp_kernel, n_hidden),
        out_shape=jax.ShapeDtypeStruct((num_tiles, 1, tb), jnp.float32),
        grid=(num_tiles,),
        in_specs=in_specs,
        out_specs=pl.BlockSpec((1, 1, tb), lambda i: (i, 0, 0)),
        compiler_params=pltpu.CompilerParams(
            dimension_semantics=("parallel",),
            vmem_limit_bytes=vmem_limit,
        ),
        cost_estimate=cost,
    )(h, *w_pads, params)

    # Lane-dense [num_tiles, 1, TB] slab -> [B, 1].  Rows >= B belong to the
    # ragged last tile: they were computed from unspecified pad data (may even
    # be NaN) and are deliberately sliced off here - not a bug.
    return out.reshape(rows)[:B].reshape(B, 1)


# ----------------------------------------------------------------------------
# FlowProp (JAX / Pallas version)
# ----------------------------------------------------------------------------
class FlowPropPallas:
    def __init__(self, latent_node_length, latent_edge_length, hidden_size, key):
        self.latent_node_length = latent_node_length
        self.latent_edge_length = latent_edge_length
        self.latent_size = latent_node_length + latent_edge_length
        self.hidden_size = tuple(hidden_size)

        # propNN layer dims: (latent_size, *hidden_size, 1)
        vh = (self.latent_size,) + self.hidden_size + (1,)
        self.weights = []
        self.biases = []
        for i in range(len(vh) - 1):
            fan_in, fan_out = vh[i], vh[i + 1]
            key, kw, kb = jax.random.split(key, 3)
            bound = 1.0 / jnp.sqrt(fan_in)  # PyTorch nn.Linear default init
            w = jax.random.uniform(kw, (fan_in, fan_out), jnp.float32,
                                   minval=-bound, maxval=bound)
            b = jax.random.uniform(kb, (1, fan_out), jnp.float32,
                                   minval=-bound, maxval=bound)
            self.weights.append(w)
            self.biases.append(b)

        # Pad / pack the propNN parameters once (bf16 weights, f32 params).
        self._w_pads, self._params, self._hp = pack_prop_params(
            self.weights, self.biases)

    # --- surrogate for MolHF encode / to_latent_format (external model) ----
    def encode(self, x, adj):
        B = x.shape[0]
        z_node = x.reshape(B, -1)
        z_edge = adj.reshape(B, -1)
        z = jnp.concatenate([z_node, z_edge], axis=1)      # [B, latent_size]
        sum_log_det_jacs = jnp.zeros((B,), jnp.float32)
        return z, sum_log_det_jacs

    def to_latent_format(self, z):
        # Emit bf16 here so the propNN kernel's dominant HBM stream is
        # half-width; with a real MolHF this cast would be folded into the
        # flow model's output instead of being a standalone convert.
        return z.astype(jnp.bfloat16)

    def forward(self, x, adj):
        z, sum_log_det_jacs = self.encode(x, adj)
        h = self.to_latent_format(z)
        output = prop_nn_pallas(h, self._w_pads, self._params)   # [B, 1]
        return output, z, sum_log_det_jacs


# ----------------------------------------------------------------------------
# Reference (pure JAX, f32) for sanity check
# ----------------------------------------------------------------------------
def prop_nn_ref(h, weights, biases):
    act = h.astype(jnp.float32)
    for i, (w, b) in enumerate(zip(weights, biases)):
        act = act @ w + b
        if i < len(weights) - 1:
            act = jnp.tanh(act)
    return act


if __name__ == "__main__":
    key = jax.random.PRNGKey(0)

    # Small shapes consistent with a molecular flow latent:
    #   x:   [B, N, node_dim]   node one-hot / features
    #   adj: [B, C, N, N]       edge tensor (channel-first)
    B, N, node_dim, edge_ch = 2, 8, 4, 4
    kx, ka, kp = jax.random.split(key, 3)
    x = jax.random.normal(kx, (B, N, node_dim), jnp.float32)
    adj = jax.random.normal(ka, (B, edge_ch, N, N), jnp.float32)

    latent_node_length = N * node_dim          # 32
    latent_edge_length = edge_ch * N * N       # 256
    hidden_size = (32, 16)

    model = FlowPropPallas(latent_node_length, latent_edge_length,
                           hidden_size, kp)

    output, z, sum_log_det_jacs = model.forward(x, adj)
    output = jax.block_until_ready(output)

    # Sanity check against the pure-JAX f32 reference of the propNN.
    # bf16 storage in the kernel => loose tolerance vs. the f32 reference.
    ref = prop_nn_ref(z, model.weights, model.biases)
    assert output.shape == (B, 1)
    assert z.shape == (B, latent_node_length + latent_edge_length)
    assert sum_log_det_jacs.shape == (B,)
    assert jnp.allclose(output, ref, atol=3e-2, rtol=3e-2)

    # Also exercise the multi-tile / ragged-last-tile path at a small size.
    kh = jax.random.PRNGKey(1)
    h_big = jax.random.normal(kh, (50, model.latent_size), jnp.float32)
    out_big = prop_nn_pallas(h_big, model._w_pads, model._params, block_b=16)
    out_big = jax.block_until_ready(out_big)
    ref_big = prop_nn_ref(h_big, model.weights, model.biases)
    assert out_big.shape == (50, 1)
    assert jnp.allclose(out_big, ref_big, atol=3e-2, rtol=3e-2)

    print("KERNEL_OK")
</pallas_src>

<mosaic_0001>
module attributes {stable_mosaic.version = 11 : i64} {
  func.func @_mlp_kernel(%arg0: i32, %arg1: memref<2x288xbf16, #tpu.memory_space<vmem>>, %arg2: memref<288x128xbf16, #tpu.memory_space<vmem>>, %arg3: memref<128x128xbf16, #tpu.memory_space<vmem>>, %arg4: memref<4x128xf32, #tpu.memory_space<vmem>>, %arg5: memref<1x1x2xf32, #tpu.memory_space<vmem>>) attributes {dimension_semantics = [#tpu.dimension_semantics<parallel>], iteration_bounds = array<i64: 1>, scalar_prefetch = 0 : i64, scratch_operands = 0 : i64, tpu.core_type = #tpu.core_type<tc>, window_params = [{transform_indices = @transform_0, window_bounds = array<i64: 2, 288>}, {pipeline_mode = #tpu.pipeline_mode<synchronous>, transform_indices = @transform_1, window_bounds = array<i64: 288, 128>}, {pipeline_mode = #tpu.pipeline_mode<synchronous>, transform_indices = @transform_2, window_bounds = array<i64: 128, 128>}, {pipeline_mode = #tpu.pipeline_mode<synchronous>, transform_indices = @transform_3, window_bounds = array<i64: 4, 128>}, {transform_indices = @transform_4, window_bounds = array<i64: 1, 1, 2>}]} {
    %c0 = arith.constant 0 : index
    %c0_0 = arith.constant 0 : index
    %0 = vector.load %arg1[%c0, %c0_0] : memref<2x288xbf16, #tpu.memory_space<vmem>>, vector<2x288xbf16>
    %c0_1 = arith.constant 0 : index
    %c0_2 = arith.constant 0 : index
    %1 = vector.load %arg2[%c0_1, %c0_2] : memref<288x128xbf16, #tpu.memory_space<vmem>>, vector<288x128xbf16>
    %c0_3 = arith.constant 0 : index
    %c0_4 = arith.constant 0 : index
    %2 = vector.load %arg4[%c0_3, %c0_4] : memref<4x128xf32, #tpu.memory_space<vmem>>, vector<1x128xf32>
    %cst = arith.constant dense<0.000000e+00> : vector<2x128xf32>
    %3 = tpu.matmul %0, %1, %cst {dimension_numbers = #tpu.dot_dimension_numbers<[1], [0], [0], [1], [0, 0, 1, 1], [], []>} : vector<2x288xbf16>, vector<288x128xbf16>, vector<2x128xf32> -> vector<2x128xf32>
    %4 = vector.broadcast %2 : vector<1x128xf32> to vector<2x128xf32>
    %5 = arith.addf %3, %4 : vector<2x128xf32>
    %6 = math.tanh %5 : vector<2x128xf32>
    %7 = arith.truncf %6 : vector<2x128xf32> to vector<2x128xbf16>
    %c0_5 = arith.constant 0 : index
    %c0_6 = arith.constant 0 : index
    %8 = vector.load %arg3[%c0_5, %c0_6] : memref<128x128xbf16, #tpu.memory_space<vmem>>, vector<128x128xbf16>
    %c1 = arith.constant 1 : index
    %c0_7 = arith.constant 0 : index
    %9 = vector.load %arg4[%c1, %c0_7] : memref<4x128xf32, #tpu.memory_space<vmem>>, vector<1x128xf32>
    %cst_8 = arith.constant dense<0.000000e+00> : vector<2x128xf32>
    %10 = tpu.matmul %7, %8, %cst_8 {dimension_numbers = #tpu.dot_dimension_numbers<[1], [0], [0], [1], [0, 0, 1, 1], [], []>} : vector<2x128xbf16>, vector<128x128xbf16>, vector<2x128xf32> -> vector<2x128xf32>
    %11 = vector.broadcast %9 : vector<1x128xf32> to vector<2x128xf32>
    %12 = arith.addf %10, %11 : vector<2x128xf32>
    %13 = math.tanh %12 : vector<2x128xf32>
    %c2 = arith.constant 2 : index
    %c0_9 = arith.constant 0 : index
    %14 = vector.load %arg4[%c2, %c0_9] : memref<4x128xf32, #tpu.memory_space<vmem>>, vector<1x128xf32>
    %c3 = arith.constant 3 : index
    %c0_10 = arith.constant 0 : index
    %15 = vector.load %arg4[%c3, %c0_10] : memref<4x128xf32, #tpu.memory_space<vmem>>, vector<1x1xf32>
    %16 = vector.extract %15[0, 0] : f32 from vector<1x1xf32>
    %17 = vector.broadcast %14 : vector<1x128xf32> to vector<2x128xf32>
    %18 = arith.mulf %13, %17 : vector<2x128xf32>
    %cst_11 = arith.constant dense<0.000000e+00> : vector<2xf32>
    %19 = vector.multi_reduction <add>, %18, %cst_11 [1] : vector<2x128xf32> to vector<2xf32>
    %20 = vector.broadcast %16 : f32 to vector<2xf32>
    %21 = arith.addf %19, %20 : vector<2xf32>
    %22 = vector.shape_cast %21 : vector<2xf32> to vector<1x1x2xf32>
    %c0_12 = arith.constant 0 : index
    %c0_13 = arith.constant 0 : index
    %c0_14 = arith.constant 0 : index
    %23 = vector.load %arg5[%c0_12, %c0_13, %c0_14] : memref<1x1x2xf32, #tpu.memory_space<vmem>>, vector<1x1x2xf32>
    tpu.vector_store %arg5[%c0_12, %c0_13, %c0_14], %22 {strides = array<i32>} : memref<1x1x2xf32, #tpu.memory_space<vmem>>, vector<1x1x2xf32>,
    return
  }
  func.func @transform_0(%arg0: i32) -> (i32, i32) {
    %c0_i32 = arith.constant 0 : i32
    %c0_i32_0 = arith.constant 0 : i32
    return %arg0, %c0_i32 : i32, i32
  }
  func.func @transform_1(%arg0: i32) -> (i32, i32) {
    %c0_i32 = arith.constant 0 : i32
    %c0_i32_0 = arith.constant 0 : i32
    %c0_i32_1 = arith.constant 0 : i32
    return %c0_i32, %c0_i32_0 : i32, i32
  }
  func.func @transform_2(%arg0: i32) -> (i32, i32) {
    %c0_i32 = arith.constant 0 : i32
    %c0_i32_0 = arith.constant 0 : i32
    %c0_i32_1 = arith.constant 0 : i32
    return %c0_i32, %c0_i32_0 : i32, i32
  }
  func.func @transform_3(%arg0: i32) -> (i32, i32) {
    %c0_i32 = arith.constant 0 : i32
    %c0_i32_0 = arith.constant 0 : i32
    %c0_i32_1 = arith.constant 0 : i32
    return %c0_i32, %c0_i32_0 : i32, i32
  }
  func.func @transform_4(%arg0: i32) -> (i32, i32, i32) {
    %c0_i32 = arith.constant 0 : i32
    %c0_i32_0 = arith.constant 0 : i32
    %c0_i32_1 = arith.constant 0 : i32
    return %arg0, %c0_i32, %c0_i32_0 : i32, i32, i32
  }
}

</mosaic_0001>

<bundles_post_ra>
// kernel: tpu_custom_call.1
= control target key start
LH: loop header
LB: loop body
LE: loop exit
PB: predicated region body
PF: predicated region fallthrough
CT: control target
= control target key end

     0   :  { %9 = vsyncpa [#allocation3], 0  ;;  %s715_s0 = inlined_call_operand.hbm [shape: bf16[2,288], index: 0, kind: input, shape index: {}]   ;;  %s716_s1 = inlined_call_operand.hbm [shape: bf16[288,128], index: 1, kind: input, shape index: {}]   ;;  %s717_s2 = inlined_call_operand.hbm [shape: bf16[128,128], index: 2, kind: input, shape index: {}]   ;;  %s718_s3 = inlined_call_operand.hbm [shape: f32[4,128], index: 3, kind: input, shape index: {}]   ;;  %s719_s4 = inlined_call_operand.hbm [shape: f32[1,1,2], index: 4, kind: output, shape index: {}]  }
   0x1   :  { %10 = vsyncpa [#allocation6], 0 }
   0x2   :  { %11 = vsyncpa [#allocation9], 0  ;;  %s28_s17 = sshll.u32 %s716_s1, 4  ;;  %s29_s17 = int_to_ptr.hbm [resolvable:$true] %s28_s17 }
   0x3   :  { %12 = vsyncpa [#allocation4], 0  ;;  %s668_s18 = smov [#allocation5]   ;;  %s18_s22 = sshll.u32 %s715_s0, 4  ;;  %s19_s22 = int_to_ptr.hbm [resolvable:$true] %s18_s22 }
   0x4   :  { %s30_s19 = sshll.u32 %s668_s18, 4  ;;  %s669_s23 = smov 64   ;;  %s31_s19 = int_to_ptr.vmem [resolvable:$true] %s30_s19 }
   0x5   :  { %s670_s24 = smov 4   ;;  %s671_s25 = smov [#allocation2]  }
   0x6   :  { %36 = dma.hbm_to_vmem [thread:$0]  %s29_s17, 2304, %s31_s19, [#allocation6], %s669_s23, %s669_s23, %s670_s24  }
   0x7   :  { %s20_s26 = sshll.u32 %s671_s25, 4  ;;  %s41_s29 = sshll.u32 %s717_s2, 4  ;;  %s21_s26 = int_to_ptr.vmem [resolvable:$true] %s20_s26  ;;  %s42_s29 = int_to_ptr.hbm [resolvable:$true] %s41_s29 }
   0x8   :  { %23 = dma.hbm_to_vmem [thread:$0]  %s19_s22, 48, %s21_s26, [#allocation3]  }
   0x9   :  { %s55_s5 = sshll.u32 %s718_s3, 4  ;;  %s672_s6 = smov [#allocation7]   ;;  %s56_s5 = int_to_ptr.hbm [resolvable:$true] %s55_s5 }
   0xa   :  { %s43_s7 = sshll.u32 %s672_s6, 4  ;;  %s673_s0 = smov [#allocation8]   ;;  %s44_s7 = int_to_ptr.vmem [resolvable:$true] %s43_s7 }
   0xb   :  { %49 = dma.hbm_to_vmem [thread:$0]  %s42_s29, 1024, %s44_s7, [#allocation6], %s669_s23, %s669_s23, %s670_s24  }
   0xc   :  { %s57_s8 = sshll.u32 %s673_s0, 4  ;;  %s58_s8 = int_to_ptr.vmem [resolvable:$true] %s57_s8 }
   0xd   :  { %60 = dma.hbm_to_vmem [thread:$0]  %s56_s5, 64, %s58_s8, [#allocation9]  }
   0xe   :  { %660 = dma.done.wait [#allocation3], 48  }
   0xf   :  { %661 = vsyncadd [#allocation3], 4294967248 }
  0x10   :  { %662 = dma.done.wait [#allocation6], 3328  }
  0x11   :  { %663 = vsyncadd [#allocation6], 4294963968 }
  0x12   :  { %664 = dma.done.wait [#allocation9], 64  }
  0x13   :  { %665 = vsyncadd [#allocation9], 4294967232  ;;  %v505_v0 = vld [vmem:[#allocation5 + $0x38] sm:$0xff]  ;;  %v504_v2 = vld [vmem:[#allocation5 + $0x30] sm:$0xff]  ;;  %vm232_vm0 = vcmask 261120   ;;  %vm361_vm1 = vcmask 1041408   ;;  %v368_v51 = vlaneseq }
  0x14   :  { %v513_v1 = vld [vmem:[#allocation5 + $0x78] sm:$0xff]  ;;  %235 = vmatpush.bf16.msra.mxu0 %v505_v0  ;;  %v512_v3 = vld [vmem:[#allocation5 + $0x70] sm:$0xff]  ;;  %v515_v4 = vld [vmem:[#allocation5 + $0x88] sm:$0xff]  ;;  %s674_s3 = smov [#allocation10]   ;;  %s381_s12 = sshll.u32 %s719_s4, 4  ;;  %vm372_vm2 = vcmask 8192   ;;  %s382_s12 = int_to_ptr.hbm [resolvable:$true] %s381_s12 }
  0x15   :  { %248 = vmatpush.bf16.msra.mxu1 %v513_v1  ;;  %267 = vmatpush.bf16.msra.mxu2 %v515_v4  ;;  %v514_v5 = vld [vmem:[#allocation5 + $0x80] sm:$0xff]  ;;  %v78_v6 = vld [vmem:[#allocation2] sm:$0x7]  ;;  %v503_v7 = vld [vmem:[#allocation5 + $0x28] sm:$0xff]  ;;  %v369_v53 = vand.u32 127, %v368_v51  ;;  %s379_s9 = sshll.u32 %s674_s3, 4  ;;  %s380_s9 = int_to_ptr.vmem [resolvable:$true] %s379_s9 }
  0x16   :  { %118 = vst [vmem:[#allocation1] ss:$9 sm:$0xff] %v78_v6  ;;  %v511_v8 = vld [vmem:[#allocation5 + $0x68] sm:$0xff]  ;;  %v522_v10 = vld [vmem:[#allocation7 + $0x30] sm:$0xff]  ;;  %v521_v14 = vld [vmem:[#allocation7 + $0x28] sm:$0xff] }
  0x17   :  { %v523_v9 = vld [vmem:[#allocation7 + $0x38] sm:$0xff]  ;;  %v502_v11 = vld [vmem:[#allocation5 + $0x20] sm:$0xff]  ;;  %v501_v15 = vld [vmem:[#allocation5 + $0x18] sm:$0xff] }
  0x18   :  { %236 = vmatpush.bf16.msra.mxu0 %v504_v2  ;;  %342 = vmatpush.bf16.msra.mxu3 %v523_v9  ;;  %v510_v12 = vld [vmem:[#allocation5 + $0x60] sm:$0xff]  ;;  %v509_v16 = vld [vmem:[#allocation5 + $0x58] sm:$0xff]  ;;  %v500_v17 = vld [vmem:[#allocation5 + $0x10] sm:$0xff] }
  0x19   :  { %249 = vmatpush.bf16.msra.mxu1 %v512_v3  ;;  %268 = vmatpush.bf16.msra.mxu2 %v514_v5  ;;  %v508_v18 = vld [vmem:[#allocation5 + $0x50] sm:$0xff]  ;;  %v499_v19 = vld [vmem:[#allocation5 + $0x8] sm:$0xff]  ;;  %v498_v21 = vld [vmem:[#allocation5] sm:$0xff] }
  0x1a   :  { %v507_v20 = vld [vmem:[#allocation5 + $0x48] sm:$0xff]  ;;  %v506_v22 = vld [vmem:[#allocation5 + $0x40] sm:$0xff]  ;;  %v520_v25 = vld [vmem:[#allocation7 + $0x20] sm:$0xff] }
  0x1b   :  { %v519_v26 = vld [vmem:[#allocation7 + $0x18] sm:$0xff]  ;;  %v518_v27 = vld [vmem:[#allocation7 + $0x10] sm:$0xff]  ;;  %v517_v28 = vld [vmem:[#allocation7 + $0x8] sm:$0xff] }
  0x1c   :  { %237 = vmatpush.bf16.msra.mxu0 %v503_v7  ;;  %343 = vmatpush.bf16.msra.mxu3 %v522_v10  ;;  %v516_v29 = vld [vmem:[#allocation7] sm:$0xff] }
  0x1d   :  { %250 = vmatpush.bf16.msra.mxu1 %v511_v8  ;;  %v121_v13 = vld [vmem:[#allocation1 + $0x12] sm:$0xff]  ;;  %v119_v23 = vld [vmem:[#allocation1] sm:$0xff]  ;;  %v120_v24 = vld [vmem:[#allocation1 + $0x9] sm:$0xff] }
  0x1e   :  { %465 = vmatmul.msk.bf16.vlgmr.msra.gmra.mxu2 %vm232_vm0, %v121_v13  ;;  %v533_v32 = vld [vmem:[#allocation8] ss:$0 sm:$0xff]  ;;  %v357_v42 = vld [vmem:[#allocation8 + $0x3] sm:$0x1]  ;;  %v534_v43 = vld [vmem:[#allocation8 + $0x1] ss:$0 sm:$0xff] }
  0x1f   :  { %524 = vpush %v357_v42  ;;  %v535_v46 = vld [vmem:[#allocation8 + $0x2] ss:$0 sm:$0xff] }
  0x20   :  { %238 = vmatpush.bf16.msra.mxu0 %v502_v11  ;;  %344 = vmatpush.bf16.msra.mxu3 %v521_v14 }
  0x21   :  { %251 = vmatpush.bf16.msra.mxu1 %v510_v12 }
  0x24   :  { %239 = vmatpush.bf16.msra.mxu0 %v501_v15  ;;  %345 = vmatpush.bf16.msra.mxu3 %v520_v25 }
  0x25   :  { %252 = vmatpush.bf16.msra.mxu1 %v509_v16 }
  0x28   :  { %240 = vmatpush.bf16.msra.mxu0 %v500_v17  ;;  %346 = vmatpush.bf16.msra.mxu3 %v519_v26 }
  0x29   :  { %253 = vmatpush.bf16.msra.mxu1 %v508_v18 }
  0x2c   :  { %241 = vmatpush.bf16.msra.mxu0 %v499_v19  ;;  %347 = vmatpush.bf16.msra.mxu3 %v518_v27 }
  0x2d   :  { %254 = vmatpush.bf16.msra.mxu1 %v507_v20 }
  0x30   :  { %242 = vmatpush.bf16.msra.mxu0 %v498_v21  ;;  %348 = vmatpush.bf16.msra.mxu3 %v517_v28 }
  0x31   :  { %255 = vmatpush.bf16.msra.mxu1 %v506_v22 }
  0x33   :  { %243 = vmatmul.bf16.vlgmr.msra.gmra.mxu0 %v119_v23 }
  0x34   :  { %256 = vmatmul.bf16.vlgmr.msra.gmra.mxu1 %v120_v24  ;;  %349 = vmatpush.bf16.msra.mxu3 %v516_v29 }
  0x50   :  { %s525_s2 = spop %524 }
  0x51   :  { %v365_v52 = vstv %s525_s2 }
  0xa1   :  { %v270_v30 = vpop.f32.mrf.mxu2 }
  0xa9   :  { %v272_v31 = vpop.f32.mrf.mxu2 }
  0xb0   :  { %v244_v33 = vpop.f32.mrf.mxu0 }
  0xb1   :  { %v257_v34 = vpop.f32.mrf.mxu1  ;;  %v245_v35 = vadd.f32 %v533_v32, %v244_v33 }
  0xb3   :  { %v258_v36 = vadd.f32 %v257_v34, %v245_v35 }
  0xb5   :  { %v271_v37 = vadd.f32 %v270_v30, %v258_v36 }
  0xb7   :  { %536 = vtanh.f32 %v271_v37 }
  0xb8   :  { %v246_v38 = vpop.f32.mrf.mxu0 }
  0xb9   :  { %v259_v39 = vpop.f32.mrf.mxu1 }
  0xbd   :  { %v537_v40 = vpop.eup %536 }
  0xbe   :  { %v275_v41 = vpack.c.bf16 %v537_v40, %v537_v40 }
  0xc0   :  { %350 = vmatmul.bf16.vlgmr.msra.gmra.mxu3 %v275_v41 }
 0x143   :  { %v351_v44 = vpop.f32.mrf.mxu3 }
 0x144   :  { %v352_v45 = vadd.f32 %v534_v43, %v351_v44 }
 0x146   :  { %538 = vtanh.f32 %v352_v45 }
 0x14b   :  { %v353_v47 = vpop.f32.mrf.mxu3 }
 0x14c   :  { %v539_v48 = vpop.eup %538 }
 0x14d   :  { %v360_v49 = vmul.f32 %v539_v48, %v535_v46 }
 0x14f   :  { %v362_v50 = vsel %vm361_vm1, %v360_v49, 0.0 }
 0x150   :  { %363 = vadd.xlane.f32.xlu0 %v362_v50 }
 0x1c3   :  { %v364_v54 = vpop.xlane.xlu0 %363 }
 0x1c4   :  { %v366_v55 = vadd.f32 %v365_v52, %v364_v54 }
 0x1c6   :  { %v370_v56 = vperm.slane %v366_v55, %v369_v53 }
 0x1c8   :  { %373 = vst.msk [vmem:[#allocation10] sm:$0x1] %vm372_vm2, %v370_v56 }
 0x1c9   :  { %384 = dma.vmem_to_hbm [thread:$0]  %s380_s9, 16, %s382_s12, [#allocation4]  }
 0x1ca   :  { %666 = dma.done.wait [#allocation4], 16  }
 0x1cb   :  { %667 = vsyncadd [#allocation4], 4294967280 }
 0x1cc   :  { %389 = vsyncpa [#allocation3], 1 }
 0x1cd   :  { %390 = vsyncpa [#allocation6], 1 }
 0x1ce   :  { %391 = vsyncpa [#allocation9], 1 }
 0x1cf   :  { %392 = vsyncpa [#allocation4], 1 }

</bundles_post_ra>
